<compile_context>
chip_gen: v5e
topology: v5e:2x2
jax: 0.10.0
libtpu: 0.0.40
codegen_flags: <defaults>
</compile_context>

<pallas_src>
import functools

import jax
import jax.numpy as jnp
from jax.experimental import pallas as pl
from jax.experimental.pallas import tpu as pltpu

_LANE = 128                    # lane width (last block dim)
_SUB = 8                       # sublane granularity
_TILE = _SUB * _LANE           # 1024: flat pad granularity
_TARGET_BLOCK_BYTES = 8 << 20  # ~8 MiB of input streamed per grid step


def _dice_kernel(x_ref, t_ref, o_ref, *, block_rows, mask_last, full_rows, rem):
    # Upcast in-kernel so HBM traffic stays in the inputs' native dtypes.
    x = x_ref[...].astype(jnp.float32)
    t = t_ref[...].astype(jnp.float32)
    s = jax.nn.sigmoid(x)          # exp on the EUP slot
    # TODO(synk): on v7x, if VALU ever saturates, swap to
    # pl.reciprocal(1 + exp(-x), approx=True); skipped here to keep exact
    # parity with the f32 sigmoid reference.

    def _reduce_store(s_v, t_v):
        st = s_v * t_v
        fold = (block_rows // _SUB, _SUB, _LANE)
        # Layout-preserving reshape; the sums are pure VPU adds into (8,128)
        # partials, stored as full lane-dense vregs (no in-kernel XLU reduce).
        o_ref[0, 0] = jnp.sum(st.reshape(fold), axis=0)
        o_ref[0, 1] = jnp.sum(s_v.reshape(fold), axis=0)
        o_ref[0, 2] = jnp.sum(t_v.reshape(fold), axis=0)

    if mask_last:
        is_last = pl.program_id(0) == pl.num_programs(0) - 1

        @pl.when(jnp.logical_not(is_last))
        def _plain():
            _reduce_store(s, t)

        @pl.when(is_last)
        def _masked():
            # Only the last grid step can contain pad / out-of-bounds rows.
            row = jax.lax.broadcasted_iota(jnp.int32, (block_rows, _LANE), 0)
            lane = jax.lax.broadcasted_iota(jnp.int32, (block_rows, _LANE), 1)
            valid = (row < full_rows) | ((row == full_rows) & (lane < rem))
            _reduce_store(jnp.where(valid, s, 0.0), jnp.where(valid, t, 0.0))
    else:
        _reduce_store(s, t)


def dice_loss(inputs, targets, smooth=1.0):
    """Pallas TPU implementation of DiceLoss.forward."""
    x = inputs.reshape(-1)          # keep native dtype (bf16 stays bf16)
    t = targets.reshape(-1)
    if t.dtype == jnp.bool_:
        t = t.astype(jnp.int8)      # 1 B/elem stream; f32 upcast is in-kernel
    n = x.shape[0]

    # Pad only up to a multiple of 8*128 so the flat view reshapes cleanly to
    # (rows, 128); typical NCHW inputs hit the no-pad path.
    padded = pl.cdiv(n, _TILE) * _TILE
    pad = padded - n
    if pad:
        # TODO(synk): a fully copy-free ragged tail needs a manual-DMA /
        # prefix+tail split; this pads (and copies) only when n % 1024 != 0.
        x = jnp.pad(x, (0, pad))
        t = jnp.pad(t, (0, pad))

    rows = padded // _LANE
    x2 = x.reshape(rows, _LANE)
    t2 = t.reshape(rows, _LANE)

    # Block size targeting ~8 MiB of input per step (both operands combined).
    bytes_per_row = _LANE * (x2.dtype.itemsize + t2.dtype.itemsize)
    block_rows = max(_TARGET_BLOCK_BYTES // bytes_per_row, 256)
    block_rows = (block_rows // 32) * 32     # (32,128)-tile safe for int8/bf16
    if block_rows >= rows:
        block_rows = rows                    # full dim; rows % 8 == 0 via pad
    num_blocks = pl.cdiv(rows, block_rows)

    # Valid-element bookkeeping for the (single) masked last block.
    valid_last = n - (num_blocks - 1) * block_rows * _LANE
    mask_last = valid_last < block_rows * _LANE

    kernel = functools.partial(
        _dice_kernel,
        block_rows=block_rows,
        mask_last=bool(mask_last),
        full_rows=valid_last // _LANE,
        rem=valid_last % _LANE,
    )

    # Double-buffered input blocks + headroom; covers v5e's 16 MiB default.
    vmem_limit = int(2 * block_rows * bytes_per_row + (4 << 20))

    parts = pl.pallas_call(
        kernel,
        out_shape=jax.ShapeDtypeStruct((num_blocks, 3, _SUB, _LANE),
                                       jnp.float32),
        grid_spec=pltpu.PrefetchScalarGridSpec(
            num_scalar_prefetch=0,
            grid=(num_blocks,),
            in_specs=[
                pl.BlockSpec((block_rows, _LANE), lambda i: (i, 0)),
                pl.BlockSpec((block_rows, _LANE), lambda i: (i, 0)),
            ],
            out_specs=pl.BlockSpec((1, 3, _SUB, _LANE),
                                   lambda i: (i, 0, 0, 0)),
        ),
        compiler_params=pltpu.CompilerParams(
            dimension_semantics=("parallel",),   # megacore split on v7x
            vmem_limit_bytes=vmem_limit,
        ),
    )(x2, t2)

    # Tiny finalize in plain JAX: combine per-block partials + dice formula.
    sums = jnp.sum(parts, axis=(0, 2, 3))        # [intersection, sum_s, sum_t]
    dice = (2.0 * sums[0] + smooth) / (sums[1] + sums[2] + smooth)
    return (1.0 - dice).astype(jnp.float32)


def _dice_loss_ref(inputs, targets, smooth=1.0):
    s = jax.nn.sigmoid(inputs.reshape(-1).astype(jnp.float32))
    t = targets.reshape(-1).astype(jnp.float32)
    inter = jnp.sum(s * t)
    dice = (2.0 * inter + smooth) / (jnp.sum(s) + jnp.sum(t) + smooth)
    return 1.0 - dice


if __name__ == "__main__":
    key = jax.random.PRNGKey(0)
    k1, k2, k3, k4, k5, k6 = jax.random.split(key, 6)

    # 1) NCHW logits / f32 binary targets, lane-aligned (no pad, no mask).
    inputs = jax.random.normal(k1, (2, 4, 16, 16), dtype=jnp.float32)
    targets = jax.random.bernoulli(k2, 0.5, (2, 4, 16, 16)).astype(jnp.float32)
    loss = jax.block_until_ready(dice_loss(inputs, targets, smooth=1.0))
    ref = _dice_loss_ref(inputs, targets, smooth=1.0)
    assert jnp.allclose(loss, ref, atol=1e-5, rtol=1e-5), (loss, ref)

    # 2) Ragged size + bool targets (int8 streaming path + masked last step).
    x_odd = jax.random.normal(k3, (3, 5, 7, 11), dtype=jnp.float32)
    t_odd = jax.random.bernoulli(k4, 0.5, (3, 5, 7, 11))
    loss2 = jax.block_until_ready(dice_loss(x_odd, t_odd, smooth=1.0))
    ref2 = _dice_loss_ref(x_odd, t_odd, smooth=1.0)
    assert jnp.allclose(loss2, ref2, atol=1e-5, rtol=1e-5), (loss2, ref2)

    # 3) bf16 logits + bool targets (narrowest-dtype streaming).
    x_bf16 = inputs.astype(jnp.bfloat16)
    t_bool = targets.astype(jnp.bool_)
    loss3 = jax.block_until_ready(dice_loss(x_bf16, t_bool, smooth=1.0))
    ref3 = _dice_loss_ref(x_bf16, t_bool, smooth=1.0)
    assert jnp.allclose(loss3, ref3, atol=1e-5, rtol=1e-5), (loss3, ref3)

    # 4) Multi-block grid (exercises the "parallel" axis / per-block partials).
    x_big = jax.random.normal(k5, (2, 16, 256, 256), dtype=jnp.float32)
    t_big = jax.random.bernoulli(k6, 0.5, (2, 16, 256, 256)).astype(jnp.float32)
    loss4 = jax.block_until_ready(dice_loss(x_big, t_big, smooth=1.0))
    ref4 = _dice_loss_ref(x_big, t_big, smooth=1.0)
    assert jnp.allclose(loss4, ref4, atol=1e-4, rtol=1e-4), (loss4, ref4)

    print("KERNEL_OK")
</pallas_src>

<mosaic_0001>
module attributes {stable_mosaic.version = 11 : i64} {
  func.func @_dice_kernel(%arg0: i32, %arg1: memref<16x128xf32, #tpu.memory_space<vmem>>, %arg2: memref<16x128xf32, #tpu.memory_space<vmem>>, %arg3: memref<1x3x8x128xf32, #tpu.memory_space<vmem>>) attributes {dimension_semantics = [#tpu.dimension_semantics<parallel>], iteration_bounds = array<i64: 1>, scalar_prefetch = 0 : i64, scratch_operands = 0 : i64, tpu.core_type = #tpu.core_type<tc>, window_params = [{transform_indices = @transform_0, window_bounds = array<i64: 16, 128>}, {transform_indices = @transform_1, window_bounds = array<i64: 16, 128>}, {transform_indices = @transform_2, window_bounds = array<i64: 1, 3, 8, 128>}]} {
    %c0 = arith.constant 0 : index
    %c0_0 = arith.constant 0 : index
    %0 = vector.load %arg1[%c0, %c0_0] : memref<16x128xf32, #tpu.memory_space<vmem>>, vector<16x128xf32>
    %c0_1 = arith.constant 0 : index
    %c0_2 = arith.constant 0 : index
    %1 = vector.load %arg2[%c0_1, %c0_2] : memref<16x128xf32, #tpu.memory_space<vmem>>, vector<16x128xf32>
    %2 = arith.negf %0 : vector<16x128xf32>
    %3 = math.exp %2 : vector<16x128xf32>
    %cst = arith.constant 1.000000e+00 : f32
    %4 = vector.broadcast %cst : f32 to vector<16x128xf32>
    %5 = arith.addf %4, %3 : vector<16x128xf32>
    %6 = arith.divf %4, %5 : vector<16x128xf32>
    %7 = arith.mulf %6, %1 : vector<16x128xf32>
    %8 = vector.shape_cast %7 : vector<16x128xf32> to vector<2x8x128xf32>
    %cst_3 = arith.constant dense<0.000000e+00> : vector<8x128xf32>
    %9 = vector.multi_reduction <add>, %8, %cst_3 [0] : vector<2x8x128xf32> to vector<8x128xf32>
    %c0_4 = arith.constant 0 : index
    %c0_5 = arith.constant 0 : index
    %c0_6 = arith.constant 0 : index
    %c0_7 = arith.constant 0 : index
    %10 = vector.load %arg3[%c0_4, %c0_5, %c0_6, %c0_7] : memref<1x3x8x128xf32, #tpu.memory_space<vmem>>, vector<1x1x8x128xf32>
    %11 = vector.shape_cast %10 : vector<1x1x8x128xf32> to vector<8x128xf32>
    %12 = vector.shape_cast %9 : vector<8x128xf32> to vector<1x1x8x128xf32>
    tpu.vector_store %arg3[%c0_4, %c0_5, %c0_6, %c0_7], %12 {strides = array<i32>} : memref<1x3x8x128xf32, #tpu.memory_space<vmem>>, vector<1x1x8x128xf32>,
    %13 = vector.shape_cast %6 : vector<16x128xf32> to vector<2x8x128xf32>
    %cst_8 = arith.constant dense<0.000000e+00> : vector<8x128xf32>
    %14 = vector.multi_reduction <add>, %13, %cst_8 [0] : vector<2x8x128xf32> to vector<8x128xf32>
    %c0_9 = arith.constant 0 : index
    %c1 = arith.constant 1 : index
    %c0_10 = arith.constant 0 : index
    %c0_11 = arith.constant 0 : index
    %15 = vector.load %arg3[%c0_9, %c1, %c0_10, %c0_11] : memref<1x3x8x128xf32, #tpu.memory_space<vmem>>, vector<1x1x8x128xf32>
    %16 = vector.shape_cast %15 : vector<1x1x8x128xf32> to vector<8x128xf32>
    %17 = vector.shape_cast %14 : vector<8x128xf32> to vector<1x1x8x128xf32>
    tpu.vector_store %arg3[%c0_9, %c1, %c0_10, %c0_11], %17 {strides = array<i32>} : memref<1x3x8x128xf32, #tpu.memory_space<vmem>>, vector<1x1x8x128xf32>,
    %18 = vector.shape_cast %1 : vector<16x128xf32> to vector<2x8x128xf32>
    %cst_12 = arith.constant dense<0.000000e+00> : vector<8x128xf32>
    %19 = vector.multi_reduction <add>, %18, %cst_12 [0] : vector<2x8x128xf32> to vector<8x128xf32>
    %c0_13 = arith.constant 0 : index
    %c2 = arith.constant 2 : index
    %c0_14 = arith.constant 0 : index
    %c0_15 = arith.constant 0 : index
    %20 = vector.load %arg3[%c0_13, %c2, %c0_14, %c0_15] : memref<1x3x8x128xf32, #tpu.memory_space<vmem>>, vector<1x1x8x128xf32>
    %21 = vector.shape_cast %20 : vector<1x1x8x128xf32> to vector<8x128xf32>
    %22 = vector.shape_cast %19 : vector<8x128xf32> to vector<1x1x8x128xf32>
    tpu.vector_store %arg3[%c0_13, %c2, %c0_14, %c0_15], %22 {strides = array<i32>} : memref<1x3x8x128xf32, #tpu.memory_space<vmem>>, vector<1x1x8x128xf32>,
    return
  }
  func.func @transform_0(%arg0: i32) -> (i32, i32) {
    %c0_i32 = arith.constant 0 : i32
    %c0_i32_0 = arith.constant 0 : i32
    return %arg0, %c0_i32 : i32, i32
  }
  func.func @transform_1(%arg0: i32) -> (i32, i32) {
    %c0_i32 = arith.constant 0 : i32
    %c0_i32_0 = arith.constant 0 : i32
    return %arg0, %c0_i32 : i32, i32
  }
  func.func @transform_2(%arg0: i32) -> (i32, i32, i32, i32) {
    %c0_i32 = arith.constant 0 : i32
    %c0_i32_0 = arith.constant 0 : i32
    %c0_i32_1 = arith.constant 0 : i32
    %c0_i32_2 = arith.constant 0 : i32
    return %arg0, %c0_i32, %c0_i32_0, %c0_i32_1 : i32, i32, i32, i32
  }
}

</mosaic_0001>

<bundles_post_ra>
// kernel: tpu_custom_call.1
= control target key start
LH: loop header
LB: loop body
LE: loop exit
PB: predicated region body
PF: predicated region fallthrough
CT: control target
= control target key end

     0   :  { %7 = vsyncpa [#allocation3], 0  ;;  %s247_s0 = inlined_call_operand.hbm [shape: f32[16,128], index: 0, kind: input, shape index: {}]   ;;  %s248_s1 = inlined_call_operand.hbm [shape: f32[16,128], index: 1, kind: input, shape index: {}]   ;;  %s249_s2 = inlined_call_operand.hbm [shape: f32[1,3,8,128], index: 2, kind: output, shape index: {}]  }
   0x1   :  { %8 = vsyncpa [#allocation6], 0 }
   0x2   :  { %9 = vsyncpa [#allocation4], 0  ;;  %s14_s11 = sshll.u32 %s247_s0, 4  ;;  %s209_s12 = smov [#allocation2]   ;;  %s15_s11 = int_to_ptr.hbm [resolvable:$true] %s14_s11 }
   0x3   :  { %s16_s13 = sshll.u32 %s209_s12, 4  ;;  %s27_s16 = sshll.u32 %s248_s1, 4  ;;  %s17_s13 = int_to_ptr.vmem [resolvable:$true] %s16_s13  ;;  %s28_s16 = int_to_ptr.hbm [resolvable:$true] %s27_s16 }
   0x4   :  { %s210_s17 = smov 128   ;;  %s211_s18 = smov 8  }
   0x5   :  { %22 = dma.hbm_to_vmem [thread:$0]  %s15_s11, 256, %s17_s13, [#allocation3], %s210_s17, %s210_s17, %s211_s18  }
   0x6   :  { %s212_s19 = smov [#allocation5]  }
   0x7   :  { %s29_s20 = sshll.u32 %s212_s19, 4  ;;  %s30_s20 = int_to_ptr.vmem [resolvable:$true] %s29_s20 }
   0x8   :  { %35 = dma.hbm_to_vmem [thread:$0]  %s28_s16, 256, %s30_s20, [#allocation6], %s210_s17, %s210_s17, %s211_s18  }
   0x9   :  { %203 = dma.done.wait [#allocation3], 256  }
   0xa   :  { %204 = vsyncadd [#allocation3], 4294967040 }
   0xb   :  { %205 = dma.done.wait [#allocation6], 256  }
   0xc   :  { %206 = vsyncadd [#allocation6], 4294967040  ;;  %v44_v0 = vld [vmem:[#allocation2] sm:$0xff]  ;;  %v45_v1 = vld [vmem:[#allocation2 + $0x8] sm:$0xff]  ;;  %s213_s0 = smov [#allocation7]   ;;  %s102_s23 = sshll.u32 %s249_s2, 4  ;;  %s103_s23 = int_to_ptr.hbm [resolvable:$true] %s102_s23 }
   0xd   :  { %v46_v2 = vld [vmem:[#allocation5] sm:$0xff]  ;;  %v47_v3 = vld [vmem:[#allocation5 + $0x8] sm:$0xff]  ;;  %v116_v4 = vmul.f32 -1.442695, %v44_v0  ;;  %v117_v5 = vmul.f32 -1.442695, %v45_v1 }
   0xe   :  { %v93_v6 = vadd.f32 %v47_v3, %v46_v2  ;;  %s100_s1 = sshll.u32 %s213_s0, 4  ;;  %s101_s1 = int_to_ptr.vmem [resolvable:$true] %s100_s1 }
   0xf   :  { %123 = vpow2.f32 %v116_v4 }
  0x10   :  { %125 = vpow2.f32 %v117_v5  ;;  %95 = vst [vmem:[#allocation7 + $0x10] sm:$0xff] %v93_v6 }
  0x15   :  { %v124_v7 = vpop.eup %123 }
  0x16   :  { %v126_v8 = vpop.eup %125  ;;  %v54_v9 = vadd.f32 1.0, %v124_v7 }
  0x17   :  { %v55_v10 = vadd.f32 1.0, %v126_v8 }
  0x18   :  { %127 = vrcp.f32 %v54_v9  ;;  %vm61_vm0 = vweird.f32 %v54_v9  ;;  %v67_v14 = vand.u32 2147483648, %v54_v9  ;;  %v65_v17 = vand.u32 2147483647, %v54_v9 }
  0x19   :  { %129 = vrcp.f32 %v55_v10  ;;  %v82_v18 = vand.u32 2147483648, %v55_v10  ;;  %vm76_vm2 = vweird.f32 %v55_v10  ;;  %v80_v20 = vand.u32 2147483647, %v55_v10 }
  0x1a   :  { %v68_v22 = vor.u32 1.1754944e-38, %v67_v14  ;;  %vm66_vm5 = vcmp.eq.f32.partialorder %v65_v17, 8.507059e+37 }
  0x1b   :  { %v83_v25 = vor.u32 1.1754944e-38, %v82_v18  ;;  %vm81_vm7 = vcmp.eq.f32.partialorder %v80_v20, 8.507059e+37 }
  0x1e   :  { %v128_v11 = vpop.eup %127 }
  0x1f   :  { %v130_v12 = vpop.eup %129  ;;  %v57_v13 = vmul.f32 %v128_v11, %v54_v9  ;;  %vm62_vm1 = vweird.f32 %v128_v11 }
  0x20   :  { %v72_v15 = vmul.f32 %v130_v12, %v55_v10  ;;  %vm77_vm3 = vweird.f32 %v130_v12  ;;  %vm63_vm4 = vmor %vm61_vm0, %vm62_vm1 }
  0x21   :  { %v58_v16 = vsub.f32 1.0, %v57_v13  ;;  %vm78_vm6 = vmor %vm76_vm2, %vm77_vm3 }
  0x22   :  { %v73_v19 = vsub.f32 1.0, %v72_v15 }
  0x23   :  { %v59_v21 = vmul.f32 %v128_v11, %v58_v16 }
  0x24   :  { %v74_v23 = vmul.f32 %v130_v12, %v73_v19 }
  0x25   :  { %v60_v24 = vadd.f32 %v128_v11, %v59_v21 }
  0x26   :  { %v75_v26 = vadd.f32 %v130_v12, %v74_v23 }
  0x27   :  { %v64_v27 = vsel %vm63_vm4, %v128_v11, %v60_v24 }
  0x28   :  { %v69_v28 = vsel %vm66_vm5, %v68_v22, %v64_v27  ;;  %v79_v29 = vsel %vm78_vm6, %v130_v12, %v75_v26 }
  0x29   :  { %v84_v30 = vsel %vm81_vm7, %v83_v25, %v79_v29  ;;  %v86_v31 = vmul.f32 %v69_v28, %v46_v2 }
  0x2a   :  { %v87_v32 = vmul.f32 %v84_v30, %v47_v3  ;;  %v90_v33 = vadd.f32 %v84_v30, %v69_v28 }
  0x2c   :  { %v88_v34 = vadd.f32 %v87_v32, %v86_v31  ;;  %92 = vst [vmem:[#allocation7 + $0x8] sm:$0xff] %v90_v33 }
  0x2e   :  { %89 = vst [vmem:[#allocation7] sm:$0xff] %v88_v34 }
  0x2f   :  { %108 = dma.vmem_to_hbm [thread:$0]  %s101_s1, 384, %s103_s23, [#allocation4], %s210_s17, %s210_s17, %s211_s18  }
  0x30   :  { %207 = dma.done.wait [#allocation4], 384  }
  0x31   :  { %208 = vsyncadd [#allocation4], 4294966912 }
  0x32   :  { %113 = vsyncpa [#allocation3], 1 }
  0x33   :  { %114 = vsyncpa [#allocation6], 1 }
  0x34   :  { %115 = vsyncpa [#allocation4], 1 }

</bundles_post_ra>
